<compile_context>
chip_gen: v6e
topology: v6e:2x2x1
jax: 0.10.0
libtpu: 0.0.40
codegen_flags: <defaults>
</compile_context>

<pallas_src>
import jax
import jax.numpy as jnp
from jax.experimental import pallas as pl
from jax.experimental.pallas import tpu as pltpu

SEG = 128  # channel width of each condition's segment


def _csn2d_kernel(c_ref, x_ref, o_ref):
    # c_ref: SMEM (1,) int32             -- condition index (scalar prefetch)
    # x_ref: VMEM (Bblk, CHBLK, HWBLK)   -- the *kept* channel segment (see in_map)
    # o_ref: VMEM (Bblk, CHBLK, HWBLK)   -- output channel block j
    keep = pl.program_id(2) == c_ref[0]

    @pl.when(keep)
    def _():
        o_ref[...] = x_ref[...]

    @pl.when(jnp.logical_not(keep))
    def _():
        o_ref[...] = jnp.zeros_like(o_ref)


def _vmem_budget():
    """(per-block byte budget, vmem_limit_bytes) chosen per chip generation."""
    cap = 0
    try:
        info = pltpu.get_tpu_info()
        for attr in ("vmem_capacity_bytes", "vmem_size_bytes", "vmem_bytes"):
            v = getattr(info, attr, None)
            if v:
                cap = int(v)
                break
    except Exception:
        cap = 0
    if not cap:
        # Unknown chip: stay under the smallest scoped-VMEM default (16 MiB on
        # v5e); the pipeline holds ~4 buffers (2x in + 2x out) per block.
        return 3 << 20, None
    if cap <= (64 << 20):             # v7x-class: 64 MiB physical VMEM per core
        return 8 << 20, 48 << 20
    return 12 << 20, 64 << 20         # v5e / v6e: 128 MiB physical VMEM


def _choose_blocks(B, C, HW, itemsize, budget):
    """(batch block, channel block, HW block) under the per-block budget."""
    chblk = SEG if C > SEG else C                 # full dim when C <= 128 (legal)
    # Spatial tile: whole HW extent if it fits, else the largest 128-multiple.
    if chblk * HW * itemsize <= budget or HW <= 128:
        hwblk = HW
    else:
        hwblk = max(128, (budget // (chblk * itemsize * 128)) * 128)
        hwblk = min(hwblk, HW)
    # Fold batch into the block only when the whole HW extent is resident.
    bblk = 1
    if hwblk == HW:
        bblk = max(1, min(B, budget // max(1, chblk * hwblk * itemsize)))
        while B % bblk != 0:
            bblk -= 1
    return bblk, chblk, hwblk


def conditional_sim_net_2d(x, c, *, block_budget_bytes=None):
    """x: (B, C, H, W) float; c: scalar (or (1,)) int condition index."""
    B, C, H, W = x.shape
    HW = H * W
    x3 = x.reshape(B, C, HW)                      # lane-dense last axis
    c_arr = jnp.asarray(c, dtype=jnp.int32).reshape((1,))

    budget, vmem_limit = _vmem_budget()
    if block_budget_bytes is not None:
        budget = block_budget_bytes
    bblk, chblk, hwblk = _choose_blocks(B, C, HW, x.dtype.itemsize, budget)

    nb = B // bblk
    nj = pl.cdiv(C, chblk)                        # output channel blocks
    nhw = pl.cdiv(HW, hwblk)
    # Channel-block axis innermost: the input block index below does not
    # depend on j, so Pallas keeps the already-resident kept segment and only
    # re-DMAs the input when the batch / HW block changes.
    grid = (nb, nhw, nj)

    def in_map(b, hw, j, c_ref):
        # Always the kept 128-channel segment.  Clamp so a degenerate
        # condition (the module's empty last mask when C <= 128) never issues
        # an out-of-range DMA; the fetched block is unused in that case.
        return (b, jnp.minimum(c_ref[0], nj - 1), hw)

    def out_map(b, hw, j, c_ref):
        return (b, j, hw)

    bytes_accessed = (B * C * HW + B * min(chblk, C) * HW) * x.dtype.itemsize

    out3 = pl.pallas_call(
        _csn2d_kernel,
        out_shape=jax.ShapeDtypeStruct((B, C, HW), x.dtype),
        grid_spec=pltpu.PrefetchScalarGridSpec(
            num_scalar_prefetch=1,
            grid=grid,
            in_specs=[pl.BlockSpec((bblk, chblk, hwblk), in_map)],
            out_specs=pl.BlockSpec((bblk, chblk, hwblk), out_map),
        ),
        compiler_params=pltpu.CompilerParams(
            dimension_semantics=("parallel", "parallel", "parallel"),
            vmem_limit_bytes=vmem_limit),
        cost_estimate=pl.CostEstimate(
            flops=0, transcendentals=0, bytes_accessed=bytes_accessed),
    )(c_arr, x3)
    return out3.reshape(B, C, H, W)


def _reference_forward(x, c):
    """Pure-JAX mirror of the PyTorch module (explicit mask-table build)."""
    B, C, H, W = x.shape
    bounds = [(0, SEG)]
    ch = SEG
    while ch + SEG < C:
        bounds.append((ch, ch + SEG))
        ch += SEG
    bounds.append((ch, C))
    cols = jnp.arange(C)
    table = jnp.stack(
        [((cols >= lo) & (cols < hi)).astype(x.dtype) for lo, hi in bounds], 0)
    mask_c = table[jnp.asarray(c, jnp.int32)]                 # (C,)
    return x * mask_c[None, :, None, None]


if __name__ == "__main__":
    key = jax.random.PRNGKey(0)
    kx, kc, kx2, kc2 = jax.random.split(key, 4)

    # Test 1: canonical small shape (C = 640 -> 5 conditions), single-block HW.
    B, C, H, W = 2, 640, 16, 16
    n_cond = (C + SEG - 1) // SEG
    x = jax.random.normal(kx, (B, C, H, W), dtype=jnp.float32)
    c = jax.random.randint(kc, (), 0, n_cond, dtype=jnp.int32)
    out = jax.block_until_ready(conditional_sim_net_2d(x, c))
    ref = _reference_forward(x, c)
    assert out.shape == (B, C, H, W)
    assert jnp.array_equal(out, ref), "mismatch vs reference (test 1)"

    # Test 2: tiny forced budget to exercise the HW-tiling / multi-axis grid path.
    B2, C2, H2, W2 = 2, 256, 16, 16
    x2 = jax.random.normal(kx2, (B2, C2, H2, W2), dtype=jnp.float32)
    c2 = jax.random.randint(kc2, (), 0, C2 // SEG, dtype=jnp.int32)
    out2 = jax.block_until_ready(
        conditional_sim_net_2d(x2, c2, block_budget_bytes=SEG * 128 * 4))
    assert jnp.array_equal(out2, _reference_forward(x2, c2)), \
        "mismatch vs reference (test 2)"

    print("KERNEL_OK")
</pallas_src>

<mosaic_0001>
module attributes {stable_mosaic.version = 11 : i64} {
  func.func @_csn2d_kernel(%arg0: i32, %arg1: i32, %arg2: i32, %arg3: memref<1xi32, #tpu.memory_space<smem>>, %arg4: memref<2x128x256xf32, #tpu.memory_space<vmem>>, %arg5: memref<2x128x256xf32, #tpu.memory_space<vmem>>) attributes {dimension_semantics = [#tpu.dimension_semantics<parallel>, #tpu.dimension_semantics<parallel>, #tpu.dimension_semantics<parallel>], iteration_bounds = array<i64: 1, 1, 5>, scalar_prefetch = 1 : i64, scratch_operands = 0 : i64, tpu.core_type = #tpu.core_type<tc>, window_params = [{transform_indices = @transform_0, window_bounds = array<i64: 2, 128, 256>}, {transform_indices = @transform_1, window_bounds = array<i64: 2, 128, 256>}]} {
    %c0 = arith.constant 0 : index
    %0 = memref.load %arg3[%c0] : memref<1xi32, #tpu.memory_space<smem>>
    %1 = arith.cmpi eq, %arg2, %0 : i32
    %2 = arith.extui %1 : i1 to i32
    %c0_i32 = arith.constant 0 : i32
    %3 = arith.cmpi ne, %2, %c0_i32 : i32
    scf.if %3 {
      %c0_1 = arith.constant 0 : index
      %c0_2 = arith.constant 0 : index
      %c0_3 = arith.constant 0 : index
      %7 = vector.load %arg4[%c0_1, %c0_2, %c0_3] : memref<2x128x256xf32, #tpu.memory_space<vmem>>, vector<2x128x256xf32>
      %c0_4 = arith.constant 0 : index
      %c0_5 = arith.constant 0 : index
      %c0_6 = arith.constant 0 : index
      %8 = vector.load %arg5[%c0_4, %c0_5, %c0_6] : memref<2x128x256xf32, #tpu.memory_space<vmem>>, vector<2x128x256xf32>
      tpu.vector_store %arg5[%c0_4, %c0_5, %c0_6], %7 {strides = array<i32>} : memref<2x128x256xf32, #tpu.memory_space<vmem>>, vector<2x128x256xf32>,
    } else {
    }
    %true = arith.constant true
    %4 = arith.xori %1, %true : i1
    %5 = arith.extui %4 : i1 to i32
    %c0_i32_0 = arith.constant 0 : i32
    %6 = arith.cmpi ne, %5, %c0_i32_0 : i32
    scf.if %6 {
      %cst = arith.constant 0.000000e+00 : f32
      %7 = vector.broadcast %cst : f32 to vector<2x128x256xf32>
      %c0_1 = arith.constant 0 : index
      %c0_2 = arith.constant 0 : index
      %c0_3 = arith.constant 0 : index
      %8 = vector.load %arg5[%c0_1, %c0_2, %c0_3] : memref<2x128x256xf32, #tpu.memory_space<vmem>>, vector<2x128x256xf32>
      tpu.vector_store %arg5[%c0_1, %c0_2, %c0_3], %7 {strides = array<i32>} : memref<2x128x256xf32, #tpu.memory_space<vmem>>, vector<2x128x256xf32>,
    } else {
    }
    return
  }
  func.func @transform_0(%arg0: i32, %arg1: i32, %arg2: i32, %arg3: memref<1xi32, #tpu.memory_space<smem>>) -> (i32, i32, i32) {
    %c0 = arith.constant 0 : index
    %0 = memref.load %arg3[%c0] : memref<1xi32, #tpu.memory_space<smem>>
    %c4_i32 = arith.constant 4 : i32
    %1 = arith.minsi %0, %c4_i32 : i32
    %c0_i32 = arith.constant 0 : i32
    return %arg0, %1, %arg1 : i32, i32, i32
  }
  func.func @transform_1(%arg0: i32, %arg1: i32, %arg2: i32, %arg3: memref<1xi32, #tpu.memory_space<smem>>) -> (i32, i32, i32) {
    %c0_i32 = arith.constant 0 : i32
    return %arg0, %arg2, %arg1 : i32, i32, i32
  }
}

</mosaic_0001>

<bundles_post_ra>
// kernel: tpu_custom_call.1
= control target key start
LH: loop header
LB: loop body
LE: loop exit
PB: predicated region body
PF: predicated region fallthrough
CT: control target
= control target key end

     0   :  { %s1113_s0 = inlined_call_operand.<no memory space> [shape: s32[1], index: 0, kind: input, shape index: {}]   ;;  %s1114_s1 = inlined_call_operand.hbm [shape: f32[2,640,256], index: 1, kind: input, shape index: {}]   ;;  %s1115_s2 = inlined_call_operand.hbm [shape: f32[2,640,256], index: 2, kind: output, shape index: {}]  }
   0x1   :  { %7 = sst [smem:[#allocation3]] %s1113_s0 }
   0x2   :  { %8 = vsyncpa [#allocation5], 0 }
   0x3   :  { %9 = vsyncpa [#allocation6], 0 }
   0x4   :  { %11 = vsyncpa [#allocation6 + $0x1], 0  ;;  %s763_s11 = smov 0   ;;  %s765_s12 = smov 0  }
   0x5   :  { %s767_s13 = smov 0   ;;  %s769_s14 = smov 0  }
   0x6   :  { %s771_s15 = smov 0   ;;  %s773_s16 = smov 0  }
   0x7   :  { %s775_s17 = smov 0   ;;  %s777_s18 = smov 0  }
   0x8 LB: > { %s525_s0 = sadd.s32 4294967295, %s729_s18   ;;  %s526_s19 = sadd.s32 4294967294, %s729_s18   ;;  %s729_s18 = sphi %s777_s18, %s17_s18   ;;  %s725_s17 = sphi %s775_s17, %s1125_s17   ;;  %s721_s16 = sphi %s773_s16, %s1124_s16   ;;  %s717_s15 = sphi %s771_s15, %s1103_s15   ;;  %s713_s14 = sphi %s769_s14, %s1123_s14   ;;  %s709_s13 = sphi %s767_s13, %s1122_s13   ;;  %s705_s12 = sphi %s765_s12, %s1121_s12   ;;  %s701_s11 = sphi %s763_s11, %s1120_s11  }
   0x9   : > { %s29_s20 = sadd.s32 1, %s725_s17  ;;  %p66_p1 = scmp.ne.s32.totalorder %s717_s15, %s713_s14 }
   0xa   : > { %p30_p0 = scmp.ge.s32.totalorder %s29_s20, 5  ;;  %p67_p2 = scmp.eq.s32.totalorder %s525_s0, 0 }
   0xb   : > { %s83_s22 = sadd.s32 1, %s709_s13  ;;  %p93_p4 = scmp.ne.s32.totalorder %s709_s13, %s705_s12 }
   0xc   : > { %s1127_s20 = smov (%p30_p0, %s29_s20), 0  ;;  %p807_p3 = por %p67_p2, %p66_p1 }
   0xd   : > { %s77_s23 = ssub.s32 %s725_s17, %s1127_s20  ;;  %p94_p6 = scmp.eq.s32.totalorder %s525_s0, 4 }
   0xe   : > { %p81_p5 = scmp.eq.s32.totalorder %s77_s23, 0  ;;  %p99_p7 = scmp.ne.s32.totalorder %s705_s12, %s701_s11 }
   0xf   : > { %p821_p8 = por %p94_p6, %p93_p4  ;;  %p100_p9 = scmp.eq.s32.totalorder %s526_s19, 4 }
  0x10   : > { %s819_s24 = scalar_select %p81_p5, %s709_s13, %s83_s22  }
  0x11   : > { %p527_p10 = scmp.ge.s32.totalorder %s729_s18, 1  ;;  %p107_p11 = scmp.lt.s32.totalorder %s729_s18, 6 }
  0x12   : > { %p827_p12 = por %p100_p9, %p99_p7 }
  0x13   : > { %p831_p13 = pnand %p527_p10, %p107_p11 }
  0x15   : > { %111 = sbr.rel (%p831_p13) target bundleno = 39 (0x27), region = 12 }
  0x1a   : > { %s116_s28 = sld [smem:[#allocation3]]  ;;  %s731_s30 = smov [#allocation4]  }
  0x1b   : > { %s547_s29 = scalar_select %p807_p3, [#allocation0], [#allocation12] }
  0x1c   : > { %s143_s3 = sshll.u32 %s731_s30, 4  ;;  %s732_s5 = smov 20480   ;;  %s144_s3 = int_to_ptr.vmem [resolvable:$true] %s143_s3 }
  0x1d   : > { %s135_s4 = sld [smem:[%s547_s29]]   ;;  %s733_s6 = smov 4096  }
  0x1e   : > { %548 = sst [smem:[#allocation9]] (%p807_p3), %s732_s5  ;;  %s734_s7 = smov 16  }
  0x1f   : > { %549 = sst [smem:[#allocation9 + $0x1]] (%p807_p3), %s733_s6  ;;  %s735_s9 = smov 256  }
  0x20   : > { %p117_p0 = scmp.lt.s32.totalorder %s116_s28, 4  ;;  %550 = sst [smem:[#allocation9 + $0x2]] (%p807_p3), %s734_s7 }
  0x21   : > { %553 = sst [smem:[#allocation9 + $0x5]] (%p807_p3), %s734_s7  ;;  %s736_s23 = smov [#allocation5]  }
  0x22   : > { %s1129_s28 = smov (!%p117_p0, %s116_s28), 4  ;;  %551 = sst [smem:[#allocation9 + $0x3]] (%p807_p3), %s735_s9 }
  0x23   : > { %s531_s8 = sshll.u32 %s135_s4, 26  ;;  %s544_s10 = sshll.u32 %s1129_s28, 12 }
  0x24   : > { %s532_s14 = sadd.s32 134217728, %s531_s8  ;;  %s130_s22 = scalar_lea.hbm %s1114_s1, %s544_s10 }
  0x25   : > { %552 = sst [smem:[#allocation9 + $0x4]] (%p807_p3), %s735_s9  ;;  %s737_s29 = smov 131072  }
  0x26   : > { %554 = dma.general (%p807_p3), %s130_s22, 8192, %s144_s3, %s736_s23, %s737_s29, [#allocation9], %s532_s14, 0  }
  0x27 PF: > { %172 = sbr.rel (%p831_p13) target bundleno = 141 (0x8d), region = 24 }
  0x2c   : > { %692 = dma.done.wait (%p807_p3), [#allocation5], 8192  }
  0x2d   : > { %694 = vsyncadd (%p807_p3), [#allocation5], 4294959104  ;;  %s184_s28 = sand.u32 1, %s705_s12   ;;  %s863_s30 = sld [smem:[#allocation3]] }
  0x2e   : > { %s534_s4 = sshll.u32 %s184_s28, 9 }
  0x2f   : > { %s867_s5 = scalar_lea.vmem [#allocation7], %s534_s4 }
  0x33   : > { %p535_p1 = scmp.ne.s32.totalorder %s721_s16, %s863_s30 }
  0x35   : > { %200 = sbr.rel (%p535_p1) target bundleno = 91 (0x5b), region = 32 }
  0x3a   : > { %v201_v0 = vld [vmem:[#allocation4] sm:$0xff]  ;;  %v202_v1 = vld [vmem:[#allocation4 + $0x8] sm:$0xff]  ;;  %v203_v2 = vld [vmem:[#allocation4 + $0x10] sm:$0xff] }
  0x3b   : > { %265 = vst [vmem:[%s867_s5] sm:$0xff] %v201_v0  ;;  %266 = vst [vmem:[%s867_s5 + $0x8] sm:$0xff] %v202_v1  ;;  %v204_v3 = vld [vmem:[#allocation4 + $0x18] sm:$0xff]  ;;  %v205_v4 = vld [vmem:[#allocation4 + $0x20] sm:$0xff] }
  0x3c   : > { %267 = vst [vmem:[%s867_s5 + $0x10] sm:$0xff] %v203_v2  ;;  %v206_v5 = vld [vmem:[#allocation4 + $0x28] sm:$0xff]  ;;  %268 = vst [vmem:[%s867_s5 + $0x18] sm:$0xff] %v204_v3  ;;  %v207_v6 = vld [vmem:[#allocation4 + $0x30] sm:$0xff] }
  0x3d   : > { %269 = vst [vmem:[%s867_s5 + $0x20] sm:$0xff] %v205_v4  ;;  %270 = vst [vmem:[%s867_s5 + $0x28] sm:$0xff] %v206_v5  ;;  %v208_v7 = vld [vmem:[#allocation4 + $0x38] sm:$0xff]  ;;  %v209_v8 = vld [vmem:[#allocation4 + $0x40] sm:$0xff] }
  0x3e   : > { %271 = vst [vmem:[%s867_s5 + $0x30] sm:$0xff] %v207_v6  ;;  %272 = vst [vmem:[%s867_s5 + $0x38] sm:$0xff] %v208_v7  ;;  %v210_v9 = vld [vmem:[#allocation4 + $0x48] sm:$0xff]  ;;  %v211_v10 = vld [vmem:[#allocation4 + $0x50] sm:$0xff] }
  0x3f   : > { %273 = vst [vmem:[%s867_s5 + $0x40] sm:$0xff] %v209_v8  ;;  %v212_v11 = vld [vmem:[#allocation4 + $0x58] sm:$0xff]  ;;  %274 = vst [vmem:[%s867_s5 + $0x48] sm:$0xff] %v210_v9  ;;  %v213_v12 = vld [vmem:[#allocation4 + $0x60] sm:$0xff] }
  0x40   : > { %275 = vst [vmem:[%s867_s5 + $0x50] sm:$0xff] %v211_v10  ;;  %276 = vst [vmem:[%s867_s5 + $0x58] sm:$0xff] %v212_v11  ;;  %v214_v13 = vld [vmem:[#allocation4 + $0x68] sm:$0xff]  ;;  %v215_v14 = vld [vmem:[#allocation4 + $0x70] sm:$0xff] }
  0x41   : > { %277 = vst [vmem:[%s867_s5 + $0x60] sm:$0xff] %v213_v12  ;;  %278 = vst [vmem:[%s867_s5 + $0x68] sm:$0xff] %v214_v13  ;;  %v216_v15 = vld [vmem:[#allocation4 + $0x78] sm:$0xff]  ;;  %v217_v16 = vld [vmem:[#allocation4 + $0x80] sm:$0xff] }
  0x42   : > { %279 = vst [vmem:[%s867_s5 + $0x70] sm:$0xff] %v215_v14  ;;  %v218_v17 = vld [vmem:[#allocation4 + $0x88] sm:$0xff]  ;;  %280 = vst [vmem:[%s867_s5 + $0x78] sm:$0xff] %v216_v15  ;;  %v219_v18 = vld [vmem:[#allocation4 + $0x90] sm:$0xff] }
  0x43   : > { %281 = vst [vmem:[%s867_s5 + $0x80] sm:$0xff] %v217_v16  ;;  %282 = vst [vmem:[%s867_s5 + $0x88] sm:$0xff] %v218_v17  ;;  %v220_v19 = vld [vmem:[#allocation4 + $0x98] sm:$0xff]  ;;  %v221_v20 = vld [vmem:[#allocation4 + $0xa0] sm:$0xff] }
  0x44   : > { %283 = vst [vmem:[%s867_s5 + $0x90] sm:$0xff] %v219_v18  ;;  %284 = vst [vmem:[%s867_s5 + $0x98] sm:$0xff] %v220_v19  ;;  %v222_v21 = vld [vmem:[#allocation4 + $0xa8] sm:$0xff]  ;;  %v223_v22 = vld [vmem:[#allocation4 + $0xb0] sm:$0xff] }
  0x45   : > { %285 = vst [vmem:[%s867_s5 + $0xa0] sm:$0xff] %v221_v20  ;;  %v224_v23 = vld [vmem:[#allocation4 + $0xb8] sm:$0xff]  ;;  %286 = vst [vmem:[%s867_s5 + $0xa8] sm:$0xff] %v222_v21  ;;  %v225_v24 = vld [vmem:[#allocation4 + $0xc0] sm:$0xff] }
  0x46   : > { %287 = vst [vmem:[%s867_s5 + $0xb0] sm:$0xff] %v223_v22  ;;  %288 = vst [vmem:[%s867_s5 + $0xb8] sm:$0xff] %v224_v23  ;;  %v226_v25 = vld [vmem:[#allocation4 + $0xc8] sm:$0xff]  ;;  %v227_v26 = vld [vmem:[#allocation4 + $0xd0] sm:$0xff] }
  0x47   : > { %289 = vst [vmem:[%s867_s5 + $0xc0] sm:$0xff] %v225_v24  ;;  %290 = vst [vmem:[%s867_s5 + $0xc8] sm:$0xff] %v226_v25  ;;  %v228_v27 = vld [vmem:[#allocation4 + $0xd8] sm:$0xff]  ;;  %v229_v28 = vld [vmem:[#allocation4 + $0xe0] sm:$0xff] }
  0x48   : > { %291 = vst [vmem:[%s867_s5 + $0xd0] sm:$0xff] %v227_v26  ;;  %v230_v29 = vld [vmem:[#allocation4 + $0xe8] sm:$0xff]  ;;  %292 = vst [vmem:[%s867_s5 + $0xd8] sm:$0xff] %v228_v27  ;;  %v231_v30 = vld [vmem:[#allocation4 + $0xf0] sm:$0xff] }
  0x49   : > { %293 = vst [vmem:[%s867_s5 + $0xe0] sm:$0xff] %v229_v28  ;;  %294 = vst [vmem:[%s867_s5 + $0xe8] sm:$0xff] %v230_v29  ;;  %v232_v31 = vld [vmem:[#allocation4 + $0xf8] sm:$0xff]  ;;  %v233_v32 = vld [vmem:[#allocation4 + $0x100] sm:$0xff] }
  0x4a   : > { %295 = vst [vmem:[%s867_s5 + $0xf0] sm:$0xff] %v231_v30  ;;  %296 = vst [vmem:[%s867_s5 + $0xf8] sm:$0xff] %v232_v31  ;;  %v234_v33 = vld [vmem:[#allocation4 + $0x108] sm:$0xff]  ;;  %v235_v34 = vld [vmem:[#allocation4 + $0x110] sm:$0xff] }
  0x4b   : > { %297 = vst [vmem:[%s867_s5 + $0x100] sm:$0xff] %v233_v32  ;;  %v236_v35 = vld [vmem:[#allocation4 + $0x118] sm:$0xff]  ;;  %298 = vst [vmem:[%s867_s5 + $0x108] sm:$0xff] %v234_v33  ;;  %v237_v36 = vld [vmem:[#allocation4 + $0x120] sm:$0xff] }
  0x4c   : > { %299 = vst [vmem:[%s867_s5 + $0x110] sm:$0xff] %v235_v34  ;;  %300 = vst [vmem:[%s867_s5 + $0x118] sm:$0xff] %v236_v35  ;;  %v238_v37 = vld [vmem:[#allocation4 + $0x128] sm:$0xff]  ;;  %v239_v38 = vld [vmem:[#allocation4 + $0x130] sm:$0xff] }
  0x4d   : > { %301 = vst [vmem:[%s867_s5 + $0x120] sm:$0xff] %v237_v36  ;;  %302 = vst [vmem:[%s867_s5 + $0x128] sm:$0xff] %v238_v37  ;;  %v240_v39 = vld [vmem:[#allocation4 + $0x138] sm:$0xff]  ;;  %v241_v40 = vld [vmem:[#allocation4 + $0x140] sm:$0xff] }
  0x4e   : > { %303 = vst [vmem:[%s867_s5 + $0x130] sm:$0xff] %v239_v38  ;;  %v242_v41 = vld [vmem:[#allocation4 + $0x148] sm:$0xff]  ;;  %304 = vst [vmem:[%s867_s5 + $0x138] sm:$0xff] %v240_v39  ;;  %v243_v42 = vld [vmem:[#allocation4 + $0x150] sm:$0xff] }
  0x4f   : > { %305 = vst [vmem:[%s867_s5 + $0x140] sm:$0xff] %v241_v40  ;;  %306 = vst [vmem:[%s867_s5 + $0x148] sm:$0xff] %v242_v41  ;;  %v244_v43 = vld [vmem:[#allocation4 + $0x158] sm:$0xff]  ;;  %v245_v44 = vld [vmem:[#allocation4 + $0x160] sm:$0xff] }
  0x50   : > { %307 = vst [vmem:[%s867_s5 + $0x150] sm:$0xff] %v243_v42  ;;  %308 = vst [vmem:[%s867_s5 + $0x158] sm:$0xff] %v244_v43  ;;  %v246_v45 = vld [vmem:[#allocation4 + $0x168] sm:$0xff]  ;;  %v247_v46 = vld [vmem:[#allocation4 + $0x170] sm:$0xff] }
  0x51   : > { %309 = vst [vmem:[%s867_s5 + $0x160] sm:$0xff] %v245_v44  ;;  %v248_v47 = vld [vmem:[#allocation4 + $0x178] sm:$0xff]  ;;  %310 = vst [vmem:[%s867_s5 + $0x168] sm:$0xff] %v246_v45  ;;  %v249_v48 = vld [vmem:[#allocation4 + $0x180] sm:$0xff] }
  0x52   : > { %311 = vst [vmem:[%s867_s5 + $0x170] sm:$0xff] %v247_v46  ;;  %312 = vst [vmem:[%s867_s5 + $0x178] sm:$0xff] %v248_v47  ;;  %v250_v49 = vld [vmem:[#allocation4 + $0x188] sm:$0xff]  ;;  %v251_v50 = vld [vmem:[#allocation4 + $0x190] sm:$0xff] }
  0x53   : > { %313 = vst [vmem:[%s867_s5 + $0x180] sm:$0xff] %v249_v48  ;;  %314 = vst [vmem:[%s867_s5 + $0x188] sm:$0xff] %v250_v49  ;;  %v252_v51 = vld [vmem:[#allocation4 + $0x198] sm:$0xff]  ;;  %v253_v52 = vld [vmem:[#allocation4 + $0x1a0] sm:$0xff] }
  0x54   : > { %315 = vst [vmem:[%s867_s5 + $0x190] sm:$0xff] %v251_v50  ;;  %v254_v53 = vld [vmem:[#allocation4 + $0x1a8] sm:$0xff]  ;;  %316 = vst [vmem:[%s867_s5 + $0x198] sm:$0xff] %v252_v51  ;;  %v255_v54 = vld [vmem:[#allocation4 + $0x1b0] sm:$0xff] }
  0x55   : > { %317 = vst [vmem:[%s867_s5 + $0x1a0] sm:$0xff] %v253_v52  ;;  %318 = vst [vmem:[%s867_s5 + $0x1a8] sm:$0xff] %v254_v53  ;;  %v256_v55 = vld [vmem:[#allocation4 + $0x1b8] sm:$0xff]  ;;  %v257_v56 = vld [vmem:[#allocation4 + $0x1c0] sm:$0xff] }
  0x56   : > { %319 = vst [vmem:[%s867_s5 + $0x1b0] sm:$0xff] %v255_v54  ;;  %320 = vst [vmem:[%s867_s5 + $0x1b8] sm:$0xff] %v256_v55  ;;  %v258_v57 = vld [vmem:[#allocation4 + $0x1c8] sm:$0xff]  ;;  %v259_v58 = vld [vmem:[#allocation4 + $0x1d0] sm:$0xff] }
  0x57   : > { %321 = vst [vmem:[%s867_s5 + $0x1c0] sm:$0xff] %v257_v56  ;;  %v260_v59 = vld [vmem:[#allocation4 + $0x1d8] sm:$0xff]  ;;  %322 = vst [vmem:[%s867_s5 + $0x1c8] sm:$0xff] %v258_v57  ;;  %v261_v60 = vld [vmem:[#allocation4 + $0x1e0] sm:$0xff] }
  0x58   : > { %323 = vst [vmem:[%s867_s5 + $0x1d0] sm:$0xff] %v259_v58  ;;  %324 = vst [vmem:[%s867_s5 + $0x1d8] sm:$0xff] %v260_v59  ;;  %v262_v61 = vld [vmem:[#allocation4 + $0x1e8] sm:$0xff]  ;;  %v263_v62 = vld [vmem:[#allocation4 + $0x1f0] sm:$0xff] }
  0x59   : > { %325 = vst [vmem:[%s867_s5 + $0x1e0] sm:$0xff] %v261_v60  ;;  %326 = vst [vmem:[%s867_s5 + $0x1e8] sm:$0xff] %v262_v61  ;;  %v264_v63 = vld [vmem:[#allocation4 + $0x1f8] sm:$0xff] }
  0x5a   : > { %327 = vst [vmem:[%s867_s5 + $0x1f0] sm:$0xff] %v263_v62  ;;  %328 = vst [vmem:[%s867_s5 + $0x1f8] sm:$0xff] %v264_v63 }
  0x5b PF: > { %p536_p2 = scmp.eq.s32.totalorder %s721_s16, %s863_s30 }
  0x5d   : > { %332 = sbr.rel (%p536_p2) target bundleno = 131 (0x83), region = 36 }
  0x62   : > { %v738_v0 = vmov 0.0  }
  0x63   : > { %333 = vst [vmem:[%s867_s5] sm:$0xff] %v738_v0  ;;  %334 = vst [vmem:[%s867_s5 + $0x8] sm:$0xff] %v738_v0 }
  0x64   : > { %335 = vst [vmem:[%s867_s5 + $0x10] sm:$0xff] %v738_v0  ;;  %336 = vst [vmem:[%s867_s5 + $0x18] sm:$0xff] %v738_v0 }
  0x65   : > { %337 = vst [vmem:[%s867_s5 + $0x20] sm:$0xff] %v738_v0  ;;  %338 = vst [vmem:[%s867_s5 + $0x28] sm:$0xff] %v738_v0 }
  0x66   : > { %339 = vst [vmem:[%s867_s5 + $0x30] sm:$0xff] %v738_v0  ;;  %340 = vst [vmem:[%s867_s5 + $0x38] sm:$0xff] %v738_v0 }
  0x67   : > { %341 = vst [vmem:[%s867_s5 + $0x40] sm:$0xff] %v738_v0  ;;  %342 = vst [vmem:[%s867_s5 + $0x48] sm:$0xff] %v738_v0 }
  0x68   : > { %343 = vst [vmem:[%s867_s5 + $0x50] sm:$0xff] %v738_v0  ;;  %344 = vst [vmem:[%s867_s5 + $0x58] sm:$0xff] %v738_v0 }
  0x69   : > { %345 = vst [vmem:[%s867_s5 + $0x60] sm:$0xff] %v738_v0  ;;  %346 = vst [vmem:[%s867_s5 + $0x68] sm:$0xff] %v738_v0 }
  0x6a   : > { %347 = vst [vmem:[%s867_s5 + $0x70] sm:$0xff] %v738_v0  ;;  %348 = vst [vmem:[%s867_s5 + $0x78] sm:$0xff] %v738_v0 }
  0x6b   : > { %349 = vst [vmem:[%s867_s5 + $0x80] sm:$0xff] %v738_v0  ;;  %350 = vst [vmem:[%s867_s5 + $0x88] sm:$0xff] %v738_v0 }
  0x6c   : > { %351 = vst [vmem:[%s867_s5 + $0x90] sm:$0xff] %v738_v0  ;;  %352 = vst [vmem:[%s867_s5 + $0x98] sm:$0xff] %v738_v0 }
  0x6d   : > { %353 = vst [vmem:[%s867_s5 + $0xa0] sm:$0xff] %v738_v0  ;;  %354 = vst [vmem:[%s867_s5 + $0xa8] sm:$0xff] %v738_v0 }
  0x6e   : > { %355 = vst [vmem:[%s867_s5 + $0xb0] sm:$0xff] %v738_v0  ;;  %356 = vst [vmem:[%s867_s5 + $0xb8] sm:$0xff] %v738_v0 }
  0x6f   : > { %357 = vst [vmem:[%s867_s5 + $0xc0] sm:$0xff] %v738_v0  ;;  %358 = vst [vmem:[%s867_s5 + $0xc8] sm:$0xff] %v738_v0 }
  0x70   : > { %359 = vst [vmem:[%s867_s5 + $0xd0] sm:$0xff] %v738_v0  ;;  %360 = vst [vmem:[%s867_s5 + $0xd8] sm:$0xff] %v738_v0 }
  0x71   : > { %361 = vst [vmem:[%s867_s5 + $0xe0] sm:$0xff] %v738_v0  ;;  %362 = vst [vmem:[%s867_s5 + $0xe8] sm:$0xff] %v738_v0 }
  0x72   : > { %363 = vst [vmem:[%s867_s5 + $0xf0] sm:$0xff] %v738_v0  ;;  %364 = vst [vmem:[%s867_s5 + $0xf8] sm:$0xff] %v738_v0 }
  0x73   : > { %365 = vst [vmem:[%s867_s5 + $0x100] sm:$0xff] %v738_v0  ;;  %366 = vst [vmem:[%s867_s5 + $0x108] sm:$0xff] %v738_v0 }
  0x74   : > { %367 = vst [vmem:[%s867_s5 + $0x110] sm:$0xff] %v738_v0  ;;  %368 = vst [vmem:[%s867_s5 + $0x118] sm:$0xff] %v738_v0 }
  0x75   : > { %369 = vst [vmem:[%s867_s5 + $0x120] sm:$0xff] %v738_v0  ;;  %370 = vst [vmem:[%s867_s5 + $0x128] sm:$0xff] %v738_v0 }
  0x76   : > { %371 = vst [vmem:[%s867_s5 + $0x130] sm:$0xff] %v738_v0  ;;  %372 = vst [vmem:[%s867_s5 + $0x138] sm:$0xff] %v738_v0 }
  0x77   : > { %373 = vst [vmem:[%s867_s5 + $0x140] sm:$0xff] %v738_v0  ;;  %374 = vst [vmem:[%s867_s5 + $0x148] sm:$0xff] %v738_v0 }
  0x78   : > { %375 = vst [vmem:[%s867_s5 + $0x150] sm:$0xff] %v738_v0  ;;  %376 = vst [vmem:[%s867_s5 + $0x158] sm:$0xff] %v738_v0 }
  0x79   : > { %377 = vst [vmem:[%s867_s5 + $0x160] sm:$0xff] %v738_v0  ;;  %378 = vst [vmem:[%s867_s5 + $0x168] sm:$0xff] %v738_v0 }
  0x7a   : > { %379 = vst [vmem:[%s867_s5 + $0x170] sm:$0xff] %v738_v0  ;;  %380 = vst [vmem:[%s867_s5 + $0x178] sm:$0xff] %v738_v0 }
  0x7b   : > { %381 = vst [vmem:[%s867_s5 + $0x180] sm:$0xff] %v738_v0  ;;  %382 = vst [vmem:[%s867_s5 + $0x188] sm:$0xff] %v738_v0 }
  0x7c   : > { %383 = vst [vmem:[%s867_s5 + $0x190] sm:$0xff] %v738_v0  ;;  %384 = vst [vmem:[%s867_s5 + $0x198] sm:$0xff] %v738_v0 }
  0x7d   : > { %385 = vst [vmem:[%s867_s5 + $0x1a0] sm:$0xff] %v738_v0  ;;  %386 = vst [vmem:[%s867_s5 + $0x1a8] sm:$0xff] %v738_v0 }
  0x7e   : > { %387 = vst [vmem:[%s867_s5 + $0x1b0] sm:$0xff] %v738_v0  ;;  %388 = vst [vmem:[%s867_s5 + $0x1b8] sm:$0xff] %v738_v0 }
  0x7f   : > { %389 = vst [vmem:[%s867_s5 + $0x1c0] sm:$0xff] %v738_v0  ;;  %390 = vst [vmem:[%s867_s5 + $0x1c8] sm:$0xff] %v738_v0 }
  0x80   : > { %391 = vst [vmem:[%s867_s5 + $0x1d0] sm:$0xff] %v738_v0  ;;  %392 = vst [vmem:[%s867_s5 + $0x1d8] sm:$0xff] %v738_v0 }
  0x81   : > { %393 = vst [vmem:[%s867_s5 + $0x1e0] sm:$0xff] %v738_v0  ;;  %394 = vst [vmem:[%s867_s5 + $0x1e8] sm:$0xff] %v738_v0 }
  0x82   : > { %395 = vst [vmem:[%s867_s5 + $0x1f0] sm:$0xff] %v738_v0  ;;  %396 = vst [vmem:[%s867_s5 + $0x1f8] sm:$0xff] %v738_v0 }
  0x83 PF: > { %s398_s21 = scalar_lea.sflag [#allocation6], %s184_s28 }
  0x84   : > { %s546_s27 = sshll.u32 %s721_s16, 12  ;;  %s427_s3 = sshll.u32 %s867_s5, 4  ;;  %s428_s3 = int_to_ptr.vmem [resolvable:$true] %s427_s3 }
  0x85   : > { %s416_s8 = scalar_lea.hbm %s1115_s2, %s546_s27  ;;  %s739_s9 = smov 4096  }
  0x86   : > { %556 = sst [smem:[#allocation11]] (%p821_p8), %s739_s9  ;;  %s740_s10 = smov 20480  }
  0x87   : > { %557 = sst [smem:[#allocation11 + $0x1]] (%p821_p8), %s740_s10  ;;  %s741_s14 = smov 16  }
  0x88   : > { %558 = sst [smem:[#allocation11 + $0x2]] (%p821_p8), %s741_s14  ;;  %s742_s0 = smov 256  }
  0x89   : > { %559 = sst [smem:[#allocation11 + $0x3]] (%p821_p8), %s742_s0  ;;  %s743_s16 = smov 131072  }
  0x8a   : > { %560 = sst [smem:[#allocation11 + $0x4]] (%p821_p8), %s742_s0  ;;  %s744_s19 = smov 0  }
  0x8b   : > { %561 = sst [smem:[#allocation11 + $0x5]] (%p821_p8), %s741_s14 }
  0x8c   : > { %562 = dma.general (%p821_p8), %s428_s3, 8192, %s416_s8, %s398_s21, %s743_s16, [#allocation11], %s744_s19, 0  }
  0x8d PF: > { %p568_p3 = scmp.ge.s32.totalorder %s729_s18, 2  ;;  %s455_s22 = sand.u32 1, %s701_s11  }
  0x8e   : > { %s456_s23 = scalar_lea.sflag [#allocation6], %s455_s22 }
  0x8f   : > { %p565_p4 = pnand %p568_p3, %p827_p12 }
  0x91   : > { %p566_p5 = pneg %p565_p4 }
  0x93   : > { %696 = dma.done.wait (%p566_p5), %s456_s23, 8192  }
  0x94   : > { %698 = vsyncadd (%p566_p5), %s456_s23, 4294959104  ;;  %s17_s18 = sadd.s32 1, %s729_s18   ;;  %s1120_s11 = smov %s705_s12 }
  0x95   : > { %p14_p6 = scmp.ge.s32.totalorder %s17_s18, 7   ;;  %s1121_s12 = smov %s709_s13 }
  0x96   : > { %s1122_s13 = smov %s819_s24  ;;  %s1123_s14 = smov %s717_s15 }
  0x97   : > { %s1103_s15 = smov 0   ;;  %s1124_s16 = smov %s725_s17 }
  0x98   : > { %s1125_s17 = smov %s1127_s20  ;;  %16 = sbr.rel (!%p14_p6) target bundleno = 8 (0x8), region = 80 }
  0x9d   :  { %461 = vsyncpa [#allocation5], 1 }
  0x9e   :  { %463 = vsyncpa [#allocation5 + $0x1], 1 }
  0x9f   :  { %464 = vsyncpa [#allocation6], 1 }
  0xa0   :  { %466 = vsyncpa [#allocation6 + $0x1], 1 }

</bundles_post_ra>
